<compile_context>
chip_gen: v6e
topology: v6e:2x2x1
jax: 0.10.0
libtpu: 0.0.40
codegen_flags: <defaults>
</compile_context>

<pallas_src>
import numpy as np
import jax
import jax.numpy as jnp
from jax import lax
from jax.experimental import pallas as pl
from jax.experimental.pallas import tpu as pltpu

LANES = 128
MAX_BLOCK_ROWS = 2048  # (2048, 128) f32 block = 1 MiB per input buffer


def _make_kernel(br, blocks_per_part, rows_valid, need_mask):
    """Build the reduction kernel specialized for this tiling (all Python ints)."""

    def kernel(p_ref, a_ref, out_ref):
        # p_ref / a_ref : (br, 128) tiles of pred / actual
        # out_ref       : (1, 8, 128) per-part partial-sum accumulator,
        #                 resident across the "arbitrary" reduction axis.
        @pl.when(pl.program_id(1) == 0)
        def _():
            out_ref[...] = jnp.zeros_like(out_ref)

        # f32 math everywhere (correct on v5e; HBM-bound so free on v6e).
        # TODO(synk): on v7x with bf16 inputs, computing log1p in bf16 would
        # relieve the EUP bound; kept f32 for portability.
        p = p_ref[...].astype(jnp.float32)
        a = a_ref[...].astype(jnp.float32)
        d = jnp.log1p(p) - jnp.log1p(a)
        dd = d * d

        if need_mask:
            # Mask rows beyond the logical array: covers both the partial last
            # block and a fully-overrun block of a megacore part (whose
            # index_map got clamped to a valid block -> contribute exactly 0).
            start = (pl.program_id(0) * blocks_per_part + pl.program_id(1)) * br
            row_ids = start + lax.broadcasted_iota(jnp.int32, dd.shape, 0)
            dd = jnp.where(row_ids < rows_valid, dd, 0.0)

        # Fold the BR sublanes down to one (8, 128) vreg with elementwise adds
        # (aligned to vreg boundaries -> pure VALU, no XLU in the hot loop).
        out_ref[0] += jnp.sum(dd.reshape(br // 8, 8, LANES), axis=0)

    return kernel


def rmsle_loss(pred, actual):
    """RMSLELoss.forward: sqrt(mean((log1p(pred) - log1p(actual))^2)). Scalar f32."""
    assert pred.shape == actual.shape, "pred/actual shape mismatch"
    n = int(np.prod(pred.shape)) if pred.ndim > 0 else 1
    assert n > 0, "RMSLE of an empty tensor is undefined"

    # ---- layout: flatten (free bitcast); pad ONLY if lane-ragged or tiny ----
    p_flat = pred.reshape(-1)
    a_flat = actual.reshape(-1)

    rows = max(pl.cdiv(n, LANES), 8)
    padded_n = rows * LANES
    if padded_n != n:
        # Zero padding contributes exactly 0 to the sum.  This branch only
        # triggers for n % 128 != 0 or n < 1024; lane-aligned inputs are
        # passed through with no copy at all.
        p_flat = jnp.pad(p_flat, (0, padded_n - n))
        a_flat = jnp.pad(a_flat, (0, padded_n - n))
    p2d = p_flat.reshape(rows, LANES)
    a2d = a_flat.reshape(rows, LANES)

    # ---- tiling: decide the megacore split first, then the block size ----
    num_parts = 2 if rows >= 16 else 1            # v7x: both TensorCores busy
    per_part_rows = rows // num_parts
    br = min(MAX_BLOCK_ROWS, (per_part_rows // 8) * 8)   # multiple of 8, <= per-part rows
    total_blocks = pl.cdiv(rows, br)
    blocks_per_part = pl.cdiv(total_blocks, num_parts)
    need_mask = (num_parts * blocks_per_part * br) != rows

    def in_map(c, i):
        # Clamp so an overrun block (odd total_blocks on the 2nd part) never
        # addresses past the array; the kernel masks its contribution to 0
        # using the *logical* block index.
        return (jnp.minimum(c * blocks_per_part + i, total_blocks - 1), 0)

    itemsize = jnp.dtype(p2d.dtype).itemsize
    cost = pl.CostEstimate(
        flops=5 * padded_n,
        transcendentals=2 * padded_n,
        bytes_accessed=2 * padded_n * itemsize + num_parts * 8 * LANES * 4,
    )

    kernel = _make_kernel(br, blocks_per_part, rows, need_mask)

    partials = pl.pallas_call(
        kernel,
        out_shape=jax.ShapeDtypeStruct((num_parts, 8, LANES), jnp.float32),
        grid_spec=pltpu.PrefetchScalarGridSpec(
            num_scalar_prefetch=0,
            grid=(num_parts, blocks_per_part),
            in_specs=[
                pl.BlockSpec((br, LANES), in_map),
                pl.BlockSpec((br, LANES), in_map),
            ],
            out_specs=pl.BlockSpec((1, 8, LANES), lambda c, i: (c, 0, 0)),
        ),
        compiler_params=pltpu.CompilerParams(
            dimension_semantics=("parallel", "arbitrary"),
        ),
        cost_estimate=cost,
    )(p2d, a2d)

    total = jnp.sum(partials)                 # tiny epilogue reduction in the wrapper
    return jnp.sqrt(total / jnp.float32(n)).astype(jnp.float32)


if __name__ == "__main__":
    key = jax.random.PRNGKey(0)
    k1, k2 = jax.random.split(key)
    shape = (2, 4, 16, 16)
    # RMSLE assumes non-negative inputs.
    pred = jax.random.uniform(k1, shape, dtype=jnp.float32)
    actual = jax.random.uniform(k2, shape, dtype=jnp.float32)

    loss = jax.block_until_ready(rmsle_loss(pred, actual))

    # Plain-JAX reference for semantic validation.
    ref = jnp.sqrt(jnp.mean((jnp.log1p(pred) - jnp.log1p(actual)) ** 2))
    np.testing.assert_allclose(np.asarray(loss), np.asarray(ref), rtol=1e-5, atol=1e-6)

    print("KERNEL_OK")
</pallas_src>

<mosaic_0001>
module attributes {stable_mosaic.version = 11 : i64} {
  func.func @kernel(%arg0: i32, %arg1: i32, %arg2: memref<8x128xf32, #tpu.memory_space<vmem>>, %arg3: memref<8x128xf32, #tpu.memory_space<vmem>>, %arg4: memref<1x8x128xf32, #tpu.memory_space<vmem>>) attributes {dimension_semantics = [#tpu.dimension_semantics<parallel>, #tpu.dimension_semantics<arbitrary>], iteration_bounds = array<i64: 2, 1>, scalar_prefetch = 0 : i64, scratch_operands = 0 : i64, tpu.core_type = #tpu.core_type<tc>, window_params = [{transform_indices = @transform_0, window_bounds = array<i64: 8, 128>}, {transform_indices = @transform_1, window_bounds = array<i64: 8, 128>}, {transform_indices = @transform_2, window_bounds = array<i64: 1, 8, 128>}]} {
    %c0_i32 = arith.constant 0 : i32
    %0 = arith.cmpi eq, %arg1, %c0_i32 : i32
    %1 = arith.extui %0 : i1 to i32
    %c0_i32_0 = arith.constant 0 : i32
    %2 = arith.cmpi ne, %1, %c0_i32_0 : i32
    scf.if %2 {
      %cst_10 = arith.constant 0.000000e+00 : f32
      %17 = vector.broadcast %cst_10 : f32 to vector<1x8x128xf32>
      %c0_11 = arith.constant 0 : index
      %c0_12 = arith.constant 0 : index
      %c0_13 = arith.constant 0 : index
      %18 = vector.load %arg4[%c0_11, %c0_12, %c0_13] : memref<1x8x128xf32, #tpu.memory_space<vmem>>, vector<1x8x128xf32>
      tpu.vector_store %arg4[%c0_11, %c0_12, %c0_13], %17 {strides = array<i32>} : memref<1x8x128xf32, #tpu.memory_space<vmem>>, vector<1x8x128xf32>,
    } else {
    }
    %c0 = arith.constant 0 : index
    %c0_1 = arith.constant 0 : index
    %3 = vector.load %arg2[%c0, %c0_1] : memref<8x128xf32, #tpu.memory_space<vmem>>, vector<8x128xf32>
    %c0_2 = arith.constant 0 : index
    %c0_3 = arith.constant 0 : index
    %4 = vector.load %arg3[%c0_2, %c0_3] : memref<8x128xf32, #tpu.memory_space<vmem>>, vector<8x128xf32>
    %5 = math.log1p %3 : vector<8x128xf32>
    %6 = math.log1p %4 : vector<8x128xf32>
    %7 = arith.subf %5, %6 : vector<8x128xf32>
    %8 = arith.mulf %7, %7 : vector<8x128xf32>
    %c0_4 = arith.constant 0 : index
    %c0_5 = arith.constant 0 : index
    %c0_6 = arith.constant 0 : index
    %9 = vector.load %arg4[%c0_4, %c0_5, %c0_6] : memref<1x8x128xf32, #tpu.memory_space<vmem>>, vector<1x8x128xf32>
    %10 = vector.shape_cast %9 : vector<1x8x128xf32> to vector<8x128xf32>
    %11 = vector.shape_cast %8 : vector<8x128xf32> to vector<1x8x128xf32>
    %cst = arith.constant dense<0.000000e+00> : vector<8x128xf32>
    %12 = vector.multi_reduction <add>, %11, %cst [0] : vector<1x8x128xf32> to vector<8x128xf32>
    %13 = arith.addf %10, %12 : vector<8x128xf32>
    %c0_7 = arith.constant 0 : index
    %c0_8 = arith.constant 0 : index
    %c0_9 = arith.constant 0 : index
    %14 = vector.load %arg4[%c0_7, %c0_8, %c0_9] : memref<1x8x128xf32, #tpu.memory_space<vmem>>, vector<1x8x128xf32>
    %15 = vector.shape_cast %14 : vector<1x8x128xf32> to vector<8x128xf32>
    %16 = vector.shape_cast %13 : vector<8x128xf32> to vector<1x8x128xf32>
    tpu.vector_store %arg4[%c0_7, %c0_8, %c0_9], %16 {strides = array<i32>} : memref<1x8x128xf32, #tpu.memory_space<vmem>>, vector<1x8x128xf32>,
    return
  }
  func.func @transform_0(%arg0: i32, %arg1: i32) -> (i32, i32) {
    %c1_i32 = arith.constant 1 : i32
    %0 = arith.muli %arg0, %c1_i32 : i32
    %1 = arith.addi %0, %arg1 : i32
    %c1_i32_0 = arith.constant 1 : i32
    %2 = arith.minsi %1, %c1_i32_0 : i32
    %c0_i32 = arith.constant 0 : i32
    %c0_i32_1 = arith.constant 0 : i32
    return %2, %c0_i32 : i32, i32
  }
  func.func @transform_1(%arg0: i32, %arg1: i32) -> (i32, i32) {
    %c1_i32 = arith.constant 1 : i32
    %0 = arith.muli %arg0, %c1_i32 : i32
    %1 = arith.addi %0, %arg1 : i32
    %c1_i32_0 = arith.constant 1 : i32
    %2 = arith.minsi %1, %c1_i32_0 : i32
    %c0_i32 = arith.constant 0 : i32
    %c0_i32_1 = arith.constant 0 : i32
    return %2, %c0_i32 : i32, i32
  }
  func.func @transform_2(%arg0: i32, %arg1: i32) -> (i32, i32, i32) {
    %c0_i32 = arith.constant 0 : i32
    %c0_i32_0 = arith.constant 0 : i32
    %c0_i32_1 = arith.constant 0 : i32
    return %arg0, %c0_i32, %c0_i32_0 : i32, i32, i32
  }
}

</mosaic_0001>

<bundles_post_ra>
// kernel: tpu_custom_call.1
= control target key start
LH: loop header
LB: loop body
LE: loop exit
PB: predicated region body
PF: predicated region fallthrough
CT: control target
= control target key end

     0   :  { %s866_s0 = inlined_call_operand.hbm [shape: f32[16,128], index: 0, kind: input, shape index: {}]   ;;  %s867_s1 = inlined_call_operand.hbm [shape: f32[16,128], index: 1, kind: input, shape index: {}]   ;;  %s868_s2 = inlined_call_operand.hbm [shape: f32[2,8,128], index: 2, kind: output, shape index: {}]  }
   0x1   :  { %869 = sst [smem:[#allocation11_spill]] %s866_s0 }
   0x2   :  { %7 = vsyncpa [#allocation3], 0 }
   0x3   :  { %9 = vsyncpa [#allocation3 + $0x1], 0 }
   0x4   :  { %10 = vsyncpa [#allocation6], 0 }
   0x5   :  { %12 = vsyncpa [#allocation6 + $0x1], 0 }
   0x6   :  { %13 = vsyncpa [#allocation4], 0 }
   0x7   :  { %15 = vsyncpa [#allocation4 + $0x1], 0  ;;  %s674_s9 = smov 0   ;;  %s676_s10 = smov 0  }
   0x8   :  { %s678_s11 = smov 0   ;;  %s680_s12 = smov 0  }
   0x9   :  { %s682_s13 = smov 0   ;;  %s684_s14 = smov 0  }
   0xa   :  { %s686_s15 = smov 0   ;;  %s688_s16 = smov 0  }
   0xb   :  { %s690_s17 = smov 0  }
   0xc LB: > { %s378_s18 = sadd.s32 4294967295, %s654_s17   ;;  %s379_s19 = sadd.s32 4294967294, %s654_s17   ;;  %s654_s17 = sphi %s690_s17, %s21_s17   ;;  %s650_s16 = sphi %s688_s16, %s885_s16   ;;  %s646_s15 = sphi %s686_s15, %s884_s15   ;;  %s642_s14 = sphi %s684_s14, %s883_s14   ;;  %s638_s13 = sphi %s682_s13, %s882_s13   ;;  %s634_s12 = sphi %s680_s12, %s881_s12   ;;  %s630_s11 = sphi %s678_s11, %s880_s11   ;;  %s626_s10 = sphi %s676_s10, %s879_s10   ;;  %s622_s9 = sphi %s674_s9, %s878_s9  }
   0xd   : > { %s33_s20 = sadd.s32 1, %s650_s16  ;;  %p38_p0 = scmp.lt.s32.totalorder %s650_s16, 1 }
   0xe   : > { %p35_p1 = scmp.ge.s32.totalorder %s33_s20, 2  ;;  %s46_s21 = sadd.s32 1, %s642_s14 }
   0xf   : > { %s723_s22 = scalar_select %p38_p0, %s650_s16, 1 }
  0x10   : > { %s887_s20 = smov (%p35_p1, %s33_s20), 0  ;;  %p53_p2 = scmp.ne.s32.totalorder %s642_s14, %s638_s13 }
  0x11   : > { %p54_p3 = scmp.eq.s32.totalorder %s654_s17, 0  ;;  %p41_p4 = scmp.lt.s32.totalorder %s887_s20, 1 }
  0x12   : > { %p59_p5 = scmp.ne.s32.totalorder %s638_s13, %s634_s12  ;;  %p60_p7 = scmp.eq.s32.totalorder %s378_s18, 0 }
  0x13   : > { %p732_p6 = por %p54_p3, %p53_p2  ;;  %s101_s26 = ssub.s32 %s650_s16, %s887_s20 }
  0x14   : > { %s42_s24 = scalar_select %p41_p4, %s887_s20, 1 }
  0x15   : > { %p737_p8 = por %p60_p7, %p59_p5  ;;  %p102_p9 = scmp.eq.s32.totalorder %s101_s26, 0 }
  0x16   : > { %s43_s27 = ssub.s32 %s723_s22, %s42_s24  ;;  %s104_s28 = sadd.s32 1, %s630_s11 }
  0x17   : > { %p44_p10 = scmp.eq.s32.totalorder %s43_s27, 0  ;;  %p114_p11 = scmp.ne.s32.totalorder %s630_s11, %s626_s10 }
  0x18   : > { %s746_s29 = scalar_select %p102_p9, %s630_s11, %s104_s28  }
  0x19   : > { %s749_s30 = scalar_select %p44_p10, %s642_s14, %s46_s21  }
  0x1a   : > { %p115_p12 = scmp.eq.s32.totalorder %s378_s18, 1  ;;  %p120_p13 = scmp.ne.s32.totalorder %s626_s10, %s622_s9 }
  0x1b   : > { %p121_p0 = scmp.eq.s32.totalorder %s379_s19, 1  ;;  %p411_p4 = scmp.lt.s32.totalorder %s654_s17, 2 }
  0x1c   : > { %p755_p1 = por %p115_p12, %p114_p11  ;;  %s766_s5 = sand.u32 1, %s642_s14  }
  0x1d   : > { %p760_p3 = por %p121_p0, %p120_p13  ;;  %s383_s6 = sshll.u32 %s723_s22, 7 }
  0x1e   : > { %s382_s7 = sshll.u32 %s766_s5, 3  ;;  %s874_s0 = sld [smem:[#allocation11_spill]] }
  0x1f   : > { %s145_s19 = scalar_lea.vmem [#allocation2], %s382_s7  ;;  %p775_p5 = pnand %p411_p4, %p732_p6 }
  0x20   : > { %s155_s21 = sshll.u32 %s145_s19, 4  ;;  %p386_p7 = scmp.ge.s32.totalorder %s654_s17, 1  ;;  %s156_s21 = int_to_ptr.vmem [resolvable:$true] %s155_s21 }
  0x21   : > { %p181_p9 = scmp.lt.s32.totalorder %s654_s17, 3  ;;  %s142_s26 = scalar_lea.sflag [#allocation3], %s766_s5 }
  0x22   : > { %p492_p10 = pneg %p775_p5  ;;  %s503_s22 = scalar_lea.vmem %s156_s21, 128 }
  0x23   : > { %p504_p11 = scmp.ne.s32.totalorder %s156_s21, %s503_s22  ;;  %s656_s27 = smov [#allocation2]  }
  0x24   : > { %s153_s18 = scalar_lea.hbm %s874_s0, %s383_s6  ;;  %s508_s23 = sshll.u32 %s656_s27, 4  ;;  %s509_s23 = int_to_ptr.vmem [resolvable:$false] %s508_s23 }
  0x25   : > { %p506_p12 = pnand %p504_p11, %p492_p10  ;;  %s510_s28 = scalar_lea.vmem %s509_s23, 256 }
  0x26   : > { %p511_p6 = scmp.lt.s32.totalorder %s156_s21, %s509_s23  ;;  %p512_p0 = scmp.lt.s32.totalorder %s510_s28, %s503_s22 }
  0x27   : > { %p507_p13 = pneg %p506_p12 }
  0x28   : > { %p513_p4 = por %p512_p0, %p511_p6 }
  0x2a   : > { %p514_p2 = pnand %p513_p4, %p507_p13 }
  0x2c   : > { %517 = shalt.err (!%p514_p2)
}
  0x2d   : > { %403 = dma.hbm_to_vmem [thread:$0]  (!%p775_p5), %s153_s18, 128, %s156_s21, %s142_s26  }
  0x2e   : > { %p793_p11 = pnand %p386_p7, %p181_p9  ;;  %s174_s22 = scalar_lea.hbm %s867_s1, %s383_s6 }
  0x2f   : > { %s166_s27 = scalar_lea.vmem [#allocation5], %s382_s7  ;;  %s163_s28 = scalar_lea.sflag [#allocation6], %s766_s5 }
  0x30   : > { %s176_s23 = sshll.u32 %s166_s27, 4  ;;  %s657_s18 = smov [#allocation5]   ;;  %s177_s23 = int_to_ptr.vmem [resolvable:$true] %s176_s23 }
  0x31   : > { %s531_s0 = scalar_lea.vmem %s177_s23, 128  ;;  %s536_s21 = sshll.u32 %s657_s18, 4  ;;  %s537_s21 = int_to_ptr.vmem [resolvable:$false] %s536_s21 }
  0x32   : > { %p532_p2 = scmp.ne.s32.totalorder %s177_s23, %s531_s0  ;;  %s538_s26 = scalar_lea.vmem %s537_s21, 256 }
  0x33   : > { %p539_p7 = scmp.lt.s32.totalorder %s177_s23, %s537_s21  ;;  %p540_p9 = scmp.lt.s32.totalorder %s538_s26, %s531_s0 }
  0x34   : > { %p534_p12 = pnand %p532_p2, %p492_p10 }
  0x35   : > { %p541_p6 = por %p540_p9, %p539_p7 }
  0x36   : > { %p535_p13 = pneg %p534_p12 }
  0x38   : > { %p542_p0 = pnand %p541_p6, %p535_p13 }
  0x3a   : > { %545 = shalt.err (!%p542_p0)
}
  0x3b   : > { %406 = dma.hbm_to_vmem [thread:$0]  (!%p775_p5), %s174_s22, 128, %s177_s23, %s163_s28  }
  0x3c   : > { %185 = sbr.rel (%p793_p11) target bundleno = 106 (0x6a), region = 28  ;;  %s187_s5 = sand.u32 (!%p793_p11), 1, %s638_s13  }
  0x3d   : > { %s387_s6 = sshll.u32 (!%p793_p11), %s187_s5, 3  ;;  %s188_s7 = scalar_lea.sflag (!%p793_p11), [#allocation3], %s187_s5 }
  0x3e   : > { %s191_s12 = scalar_lea.vmem (!%p793_p11), [#allocation2], %s387_s6 }
  0x41   : > { %609 = dma.done.wait (%p737_p8), %s188_s7, 128  }
  0x42   : > { %611 = vsyncadd (%p737_p8), %s188_s7, 4294967168  ;;  %s197_s0 = scalar_lea.sflag [#allocation6], %s187_s5  ;;  %s200_s19 = scalar_lea.vmem [#allocation5], %s387_s6 }
  0x43   : > { %613 = dma.done.wait (%p737_p8), %s197_s0, 128  }
  0x44   : > { %615 = vsyncadd (%p737_p8), %s197_s0, 4294967168  ;;  %v237_v0 = vld [vmem:[%s191_s12] sm:$0xff]  ;;  %v238_v1 = vld [vmem:[%s200_s19] sm:$0xff]  ;;  %s223_s24 = sand.u32 1, %s626_s10   ;;  %s391_s25 = sshll.u32 %s646_s15, 7 }
  0x45   : > { %v239_v2 = vadd.f32 1.0, %v237_v0  ;;  %v248_v3 = vadd.f32 1.0, %v238_v1  ;;  %v242_v4 = vmul.f32 -0.5, %v237_v0  ;;  %v251_v5 = vmul.f32 -0.5, %v238_v1  ;;  %s389_s8 = sshll.u32 %s223_s24, 3  ;;  %s275_s18 = scalar_lea.hbm %s868_s2, %s391_s25 }
  0x46   : > { %v245_v7 = vand.u32 2147483647, %v237_v0  ;;  %v254_v9 = vand.u32 2147483647, %v238_v1  ;;  %s225_s22 = scalar_lea.vmem [#allocation7], %s389_s8  ;;  %s264_s21 = scalar_lea.sflag [#allocation4], %s223_s24 }
  0x47   : > { %486 = vlog2.f32 %v239_v2  ;;  %v243_v6 = vadd.f32 1.0, %v242_v4  ;;  %v252_v8 = vadd.f32 1.0, %v251_v5  ;;  %s277_s27 = sshll.u32 %s225_s22, 4  ;;  %s658_s5 = smov [#allocation7]   ;;  %s278_s27 = int_to_ptr.vmem [resolvable:$true] %s277_s27 }
  0x48   : > { %488 = vlog2.f32 %v248_v3  ;;  %vm246_vm0 = vcmp.lt.f32.partialorder %v245_v7, 0.0004427343  ;;  %vm255_vm1 = vcmp.lt.f32.partialorder %v254_v9, 0.0004427343  ;;  %s546_s26 = scalar_lea.vmem %s278_s27, 128  ;;  %s550_s6 = sshll.u32 %s658_s5, 4  ;;  %s551_s6 = int_to_ptr.vmem [resolvable:$false] %s550_s6 }
  0x49   : > { %v244_v10 = vmul.f32 %v243_v6, %v237_v0  ;;  %v253_v12 = vmul.f32 %v252_v8, %v238_v1  ;;  %p547_p8 = scmp.ne.s32.totalorder %s278_s27, %s546_s26  ;;  %s552_s7 = scalar_lea.vmem %s551_s6, 256 }
  0x4a   : > { %p553_p4 = scmp.lt.s32.totalorder %s278_s27, %s551_s6  ;;  %p554_p11 = scmp.lt.s32.totalorder %s552_s7, %s546_s26 }
  0x4b   : > { %p548_p5 = pnand %p547_p8, %p755_p1 }
  0x4c   : > { %p555_p2 = por %p554_p11, %p553_p4 }
  0x4d   : > { %p549_p10 = pneg %p548_p5 }
  0x4f   : > { %p556_p12 = pnand %p555_p2, %p549_p10 }
  0x54   : > { %v487_v11 = vpop.eup %486 }
  0x55   : > { %v489_v13 = vpop.eup %488  ;;  %v241_v14 = vmul.f32 0.6931472, %v487_v11 }
  0x56   : > { %v250_v15 = vmul.f32 0.6931472, %v489_v13 }
  0x57   : > { %v247_v16 = vsel %vm246_vm0, %v244_v10, %v241_v14 }
  0x58   : > { %v256_v17 = vsel %vm255_vm1, %v253_v12, %v250_v15 }
  0x59   : > { %v257_v18 = vsub.f32 %v247_v16, %v256_v17 }
  0x5b   : > { %v258_v19 = vmul.f32 %v257_v18, %v257_v18 }
  0x5d   : > { %262 = vst [vmem:[%s225_s22] sm:$0xff] %v258_v19 }
  0x5e   : > { %559 = shalt.err (!%p556_p12)
}
  0x5f   : > { %s560_s15 = scalar_lea.hbm %s275_s18, 128  ;;  %s564_s19 = scalar_lea.hbm %s868_s2, 256 }
  0x60   : > { %p561_p13 = scmp.ne.s32.totalorder %s275_s18, %s560_s15  ;;  %p565_p6 = scmp.lt.s32.totalorder %s275_s18, %s868_s2 }
  0x61   : > { %p566_p0 = scmp.lt.s32.totalorder %s564_s19, %s560_s15 }
  0x62   : > { %p562_p7 = pnand %p561_p13, %p755_p1 }
  0x63   : > { %p567_p8 = por %p566_p0, %p565_p6 }
  0x64   : > { %p563_p9 = pneg %p562_p7 }
  0x66   : > { %p568_p5 = pnand %p567_p8, %p563_p9 }
  0x68   : > { %571 = shalt.err (!%p568_p5)
}
  0x69   : > { %398 = dma.vmem_to_hbm [thread:$0]  (%p755_p1), %s278_s27, 128, %s275_s18, %s264_s21  }
  0x6a PF: > { %s289_s25 = sand.u32 1, %s622_s9   ;;  %p877_p10 = scmp.ge.s32.totalorder %s654_s17, 2 }
  0x6b   : > { %s290_s22 = scalar_lea.sflag [#allocation4], %s289_s25 }
  0x6c   : > { %p408_p4 = pnand %p877_p10, %p760_p3 }
  0x6e   : > { %p409_p11 = pneg %p408_p4 }
  0x70   : > { %617 = dma.done.wait (%p409_p11), %s290_s22, 128  }
  0x71   : > { %619 = vsyncadd (%p409_p11), %s290_s22, 4294967168  ;;  %s21_s17 = sadd.s32 1, %s654_s17   ;;  %s878_s9 = smov %s626_s10 }
  0x72   : > { %p18_p2 = scmp.ge.s32.totalorder %s21_s17, 4   ;;  %s879_s10 = smov %s630_s11 }
  0x73   : > { %s880_s11 = smov %s746_s29  ;;  %s881_s12 = smov %s638_s13 }
  0x74   : > { %s882_s13 = smov %s642_s14  ;;  %s883_s14 = smov %s749_s30 }
  0x75   : > { %s884_s15 = smov %s650_s16  ;;  %s885_s16 = smov %s887_s20 }
  0x76   :  { %20 = sbr.rel (!%p18_p2) target bundleno = 12 (0xc), region = 90 }
  0x7b   :  { %295 = vsyncpa [#allocation3], 1 }
  0x7c   :  { %297 = vsyncpa [#allocation3 + $0x1], 1 }
  0x7d   :  { %298 = vsyncpa [#allocation6], 1 }
  0x7e   :  { %300 = vsyncpa [#allocation6 + $0x1], 1 }
  0x7f   :  { %301 = vsyncpa [#allocation4], 1 }
  0x80   :  { %303 = vsyncpa [#allocation4 + $0x1], 1 }

</bundles_post_ra>
